<compile_context>
chip_gen: v7x
topology: tpu7x:2x2x1
jax: 0.10.0
libtpu: 0.0.40
codegen_flags: <defaults>
</compile_context>

<pallas_src>
import functools

import jax
import jax.numpy as jnp
from jax.experimental import pallas as pl
from jax.experimental.pallas import tpu as pltpu

KSIZE = 3
PAD = KSIZE // 2
EPS = 1e-6

# Fixed Sobel coefficients (ksize=3), identical to the PyTorch buffers (used by the ref).
SOBEL_X = ((-1.0, 0.0, 1.0), (-2.0, 0.0, 2.0), (-1.0, 0.0, 1.0))
SOBEL_Y = ((-1.0, -2.0, -1.0), (0.0, 0.0, 0.0), (1.0, 2.0, 1.0))


# --------------------------------------------------------------------------------------
# In-kernel math
# --------------------------------------------------------------------------------------
def _sobel_plane(x, m, H, W):
    """x: (sub, H*W) f32 flattened plane rows; m: 4 f32 0/1 masks (jm1, jp1, im1, ip1)."""
    hw = H * W
    m_jm1, m_jp1, m_im1, m_ip1 = m

    def lroll(v, s):
        # Roll along the flattened lane axis; normalize to a positive static shift.
        return pltpu.roll(v, shift=s % hw, axis=1)

    # Horizontal taps (zero padding at left/right image border), conv2d = cross-correlation.
    x_jp1 = lroll(x, -1) * m_jp1             # x[i, j+1]
    x_jm1 = lroll(x, 1) * m_jm1              # x[i, j-1]

    diff_h = x_jp1 - x_jm1                   # [-1, 0, 1] along W
    smooth_h = x_jm1 + (x + x) + x_jp1       # [ 1, 2, 1] along W

    # Vertical taps: rolls by +-W along the flattened axis, masked at top/bottom rows.
    d_im1 = lroll(diff_h, W) * m_im1
    d_ip1 = lroll(diff_h, -W) * m_ip1
    s_im1 = lroll(smooth_h, W) * m_im1
    s_ip1 = lroll(smooth_h, -W) * m_ip1

    gx = d_im1 + (diff_h + diff_h) + d_ip1   # [1,2,1]^T (outer) [-1,0,1]
    gy = s_ip1 - s_im1                       # [-1,0,1]^T (outer) [1,2,1]
    return jnp.sqrt(gx * gx + gy * gy + EPS)


def _for_each_chunk(n_sub, do_chunk):
    """Run do_chunk over sub-chunks; fori_loop bounds live ranges when n_sub > 1."""
    if n_sub == 1:
        do_chunk(0)
    else:
        def body(p, carry):
            do_chunk(p)
            return carry
        jax.lax.fori_loop(0, n_sub, body, 0, unroll=(n_sub <= 8))


def _sobel_kernel(masks_ref, x_ref, o_ref, *, H, W, sub):
    """x_ref: (rows, H*W) native dtype; o_ref: (rows, H*W) f32; masks_ref: (4, H*W) f32."""
    hw = H * W
    n_sub = x_ref.shape[0] // sub
    masks = masks_ref[...]
    # Hoisted sublane broadcasts (JAX does not CSE broadcast_in_dim inside the loop).
    m = tuple(jnp.broadcast_to(masks[k:k + 1, :], (sub, hw)) for k in range(4))

    def do_chunk(p):
        r = p * sub
        if not isinstance(r, int):
            r = pl.multiple_of(r, sub)
        rs = pl.ds(r, sub)
        x = x_ref[rs, :].astype(jnp.float32)          # native-dtype load, cast in-kernel
        o_ref[rs, :] = _sobel_plane(x, m, H, W)

    _for_each_chunk(n_sub, do_chunk)


def _sobel_gray_kernel(masks_ref, x_ref, o_ref, *, H, W, sub):
    """Fused grayscale mix + Sobel.
    x_ref: (rows, 3*H*W) native dtype (the 3 channel planes concatenated along lanes);
    o_ref: (rows, H*W) f32."""
    hw = H * W
    n_sub = o_ref.shape[0] // sub
    masks = masks_ref[...]
    m = tuple(jnp.broadcast_to(masks[k:k + 1, :], (sub, hw)) for k in range(4))

    def do_chunk(p):
        r = p * sub
        if not isinstance(r, int):
            r = pl.multiple_of(r, sub)
        rs = pl.ds(r, sub)
        c0 = x_ref[rs, pl.ds(0 * hw, hw)].astype(jnp.float32)
        c1 = x_ref[rs, pl.ds(1 * hw, hw)].astype(jnp.float32)
        c2 = x_ref[rs, pl.ds(2 * hw, hw)].astype(jnp.float32)
        gray = 0.299 * c0 + 0.587 * c1 + 0.114 * c2
        o_ref[rs, :] = _sobel_plane(gray, m, H, W)

    _for_each_chunk(n_sub, do_chunk)


# --------------------------------------------------------------------------------------
# Sizing helpers (generation-aware)
# --------------------------------------------------------------------------------------
def _vmem_plan():
    """(vmem_limit_bytes, block_budget_bytes) sized from this generation's VMEM."""
    try:
        cap = int(pltpu.get_tpu_info().vmem_capacity_bytes)   # 128 MiB v5e/v6e, 64 MiB v7x
    except Exception:
        cap = 64 * 1024 * 1024                                # conservative fallback
    limit = min(int(cap * 0.85), 100 * 1024 * 1024)
    return limit, int(limit * 0.8)


def _choose_block_rows(n_rows, in_cols, out_cols, in_itemsize, budget):
    """Rows per grid step: largest 8-aligned (or full) divisor of n_rows whose
    double-buffered in/out blocks plus in-kernel temporaries fit the VMEM budget,
    preferring >=2 grid steps (shardable across v7x's two TensorCores)."""
    per_row = 2 * (in_cols * in_itemsize + out_cols * 4)      # double-buffered in + f32 out
    fixed = (12 * 16 + 2 * 4) * out_cols * 4                  # sub-chunk temporaries + masks
    cands = [d for d in range(1, n_rows + 1)
             if n_rows % d == 0 and (d % 8 == 0 or d == n_rows)]
    fitting = [d for d in cands if d * per_row + fixed <= budget]
    if not fitting:
        # TODO(synk): tile H with a 1-row halo when even the smallest aligned row-block
        # exceeds the VMEM budget (very large H*W planes).
        fitting = [min(cands)]
    multi = [d for d in fitting if n_rows // d >= 2]
    # TODO(synk): when n_rows itself is the only aligned divisor (e.g. 8 planes) the grid
    # collapses to one step and v7x's second TensorCore idles; would need an H-split axis.
    return max(multi) if multi else max(fitting)


def _choose_sub(block_rows, in_itemsize):
    if in_itemsize < 4 and block_rows % 16 == 0:
        return 16                       # match sub-32-bit sublane packing
    if block_rows % 8 == 0:
        return 8
    return block_rows


def _border_masks(H, W):
    """(4, H*W) f32 0/1 masks over the flattened plane:
    [j>0 (left ok), j<W-1 (right ok), i>0 (top ok), i<H-1 (bottom ok)]."""
    col = jnp.tile(jnp.arange(W, dtype=jnp.int32), H)
    row = jnp.repeat(jnp.arange(H, dtype=jnp.int32), W)
    return jnp.stack([col > 0, col < W - 1, row > 0, row < H - 1]).astype(jnp.float32)


# --------------------------------------------------------------------------------------
# Wrapper
# --------------------------------------------------------------------------------------
def sobel_filter(x, use_grayscale=False):
    """x: (B, C, H, W) -> Sobel edge magnitude, same semantics as the PyTorch module
    (per-channel output; single grayscale channel when use_grayscale and C == 3)."""
    if not jnp.issubdtype(x.dtype, jnp.floating):
        x = x.astype(jnp.float32)
    B, C, H, W = x.shape
    hw = H * W
    itemsize = x.dtype.itemsize
    masks = _border_masks(H, W)
    vmem_limit, budget = _vmem_plan()
    cparams = pltpu.CompilerParams(dimension_semantics=("parallel",),
                                   vmem_limit_bytes=vmem_limit)
    mask_spec = pl.BlockSpec((4, hw), lambda i: (0, 0))       # same block each step

    if use_grayscale and C == 3:
        # Fused grayscale: channel planes live along the lane axis of each batch row.
        x_flat = x.reshape(B, 3 * hw)                         # metadata-only collapse
        tb = _choose_block_rows(B, 3 * hw, hw, itemsize, budget)
        sub = _choose_sub(tb, itemsize)
        out = pl.pallas_call(
            functools.partial(_sobel_gray_kernel, H=H, W=W, sub=sub),
            out_shape=jax.ShapeDtypeStruct((B, hw), jnp.float32),
            grid_spec=pltpu.PrefetchScalarGridSpec(
                num_scalar_prefetch=0,
                grid=(B // tb,),
                in_specs=[mask_spec,
                          pl.BlockSpec((tb, 3 * hw), lambda i: (i, 0))],
                out_specs=pl.BlockSpec((tb, hw), lambda i: (i, 0)),
            ),
            compiler_params=cparams,
        )(masks, x_flat)
        return out.reshape(B, 1, H, W)

    n_planes = B * C
    x_flat = x.reshape(n_planes, hw)                          # metadata-only collapse
    tbc = _choose_block_rows(n_planes, hw, hw, itemsize, budget)
    sub = _choose_sub(tbc, itemsize)
    out = pl.pallas_call(
        functools.partial(_sobel_kernel, H=H, W=W, sub=sub),
        out_shape=jax.ShapeDtypeStruct((n_planes, hw), jnp.float32),
        grid_spec=pltpu.PrefetchScalarGridSpec(
            num_scalar_prefetch=0,
            grid=(n_planes // tbc,),
            in_specs=[mask_spec,
                      pl.BlockSpec((tbc, hw), lambda i: (i, 0))],
            out_specs=pl.BlockSpec((tbc, hw), lambda i: (i, 0)),
        ),
        compiler_params=cparams,
    )(masks, x_flat)
    return out.reshape(B, C, H, W)


# --------------------------------------------------------------------------------------
# Pure-JAX reference (direct 3x3 cross-correlation, zero pad)
# --------------------------------------------------------------------------------------
def sobel_filter_ref(x, use_grayscale=False):
    x = x.astype(jnp.float32)
    if use_grayscale and x.shape[1] == 3:
        x = 0.299 * x[:, 0:1] + 0.587 * x[:, 1:2] + 0.114 * x[:, 2:3]
    B, C, H, W = x.shape
    xp = jnp.pad(x, ((0, 0), (0, 0), (PAD, PAD), (PAD, PAD)))
    gx = jnp.zeros_like(x)
    gy = jnp.zeros_like(x)
    for di in range(KSIZE):
        for dj in range(KSIZE):
            win = xp[:, :, di:di + H, dj:dj + W]
            gx = gx + SOBEL_X[di][dj] * win
            gy = gy + SOBEL_Y[di][dj] * win
    return jnp.sqrt(gx * gx + gy * gy + EPS)


if __name__ == "__main__":
    k0, k1, k2 = jax.random.split(jax.random.PRNGKey(0), 3)

    # 1) Per-channel path (module default), f32 input.
    B, C, H, W = 2, 4, 16, 16
    x = jax.random.normal(k0, (B, C, H, W), dtype=jnp.float32)
    out = jax.block_until_ready(sobel_filter(x))
    ref = sobel_filter_ref(x)
    assert out.shape == (B, C, H, W), out.shape
    assert jnp.allclose(out, ref, atol=1e-5, rtol=1e-5), \
        float(jnp.max(jnp.abs(out - ref)))

    # 2) Fused grayscale path (use_grayscale=True, C == 3).
    xg = jax.random.normal(k1, (2, 3, 16, 16), dtype=jnp.float32)
    outg = jax.block_until_ready(sobel_filter(xg, use_grayscale=True))
    refg = sobel_filter_ref(xg, use_grayscale=True)
    assert outg.shape == (2, 1, 16, 16), outg.shape
    assert jnp.allclose(outg, refg, atol=1e-5, rtol=1e-5), \
        float(jnp.max(jnp.abs(outg - refg)))

    # 3) Native bf16 input: multi-step grid + in-kernel sub-chunk loop + in-kernel cast.
    xb = jax.random.normal(k2, (8, 16, 16, 16), dtype=jnp.bfloat16)
    outb = jax.block_until_ready(sobel_filter(xb))
    refb = sobel_filter_ref(xb)
    assert outb.shape == (8, 16, 16, 16), outb.shape
    assert jnp.allclose(outb, refb, atol=1e-5, rtol=1e-5), \
        float(jnp.max(jnp.abs(outb - refb)))

    print("KERNEL_OK")
</pallas_src>

<mosaic_0001>
module attributes {stable_mosaic.version = 11 : i64} {
  func.func @_sobel_kernel(%arg0: i32, %arg1: memref<4x256xf32, #tpu.memory_space<vmem>>, %arg2: memref<8x256xf32, #tpu.memory_space<vmem>>, %arg3: memref<8x256xf32, #tpu.memory_space<vmem>>) attributes {dimension_semantics = [#tpu.dimension_semantics<parallel>], iteration_bounds = array<i64: 1>, scalar_prefetch = 0 : i64, scratch_operands = 0 : i64, tpu.core_type = #tpu.core_type<tc>, window_params = [{pipeline_mode = #tpu.pipeline_mode<synchronous>, transform_indices = @transform_0, window_bounds = array<i64: 4, 256>}, {transform_indices = @transform_1, window_bounds = array<i64: 8, 256>}, {transform_indices = @transform_2, window_bounds = array<i64: 8, 256>}]} {
    %c0 = arith.constant 0 : index
    %c0_0 = arith.constant 0 : index
    %0 = vector.load %arg1[%c0, %c0_0] : memref<4x256xf32, #tpu.memory_space<vmem>>, vector<4x256xf32>
    %1 = vector.extract_strided_slice %0 {offsets = [0, 0], sizes = [1, 256], strides = [1, 1]} : vector<4x256xf32> to vector<1x256xf32>
    %2 = vector.shape_cast %1 : vector<1x256xf32> to vector<1x256xf32>
    %3 = vector.broadcast %2 : vector<1x256xf32> to vector<8x256xf32>
    %4 = vector.extract_strided_slice %0 {offsets = [1, 0], sizes = [1, 256], strides = [1, 1]} : vector<4x256xf32> to vector<1x256xf32>
    %5 = vector.shape_cast %4 : vector<1x256xf32> to vector<1x256xf32>
    %6 = vector.broadcast %5 : vector<1x256xf32> to vector<8x256xf32>
    %7 = vector.extract_strided_slice %0 {offsets = [2, 0], sizes = [1, 256], strides = [1, 1]} : vector<4x256xf32> to vector<1x256xf32>
    %8 = vector.shape_cast %7 : vector<1x256xf32> to vector<1x256xf32>
    %9 = vector.broadcast %8 : vector<1x256xf32> to vector<8x256xf32>
    %10 = vector.extract_strided_slice %0 {offsets = [3, 0], sizes = [1, 256], strides = [1, 1]} : vector<4x256xf32> to vector<1x256xf32>
    %11 = vector.shape_cast %10 : vector<1x256xf32> to vector<1x256xf32>
    %12 = vector.broadcast %11 : vector<1x256xf32> to vector<8x256xf32>
    %c0_1 = arith.constant 0 : index
    %c0_2 = arith.constant 0 : index
    %13 = vector.load %arg2[%c0_1, %c0_2] : memref<8x256xf32, #tpu.memory_space<vmem>>, vector<8x256xf32>
    %c255_i32 = arith.constant 255 : i32
    %14 = tpu.dynamic_rotate %13 by %c255_i32 dim 1 : vector<8x256xf32>, i32 -> vector<8x256xf32>
    %15 = arith.mulf %14, %6 : vector<8x256xf32>
    %c1_i32 = arith.constant 1 : i32
    %16 = tpu.dynamic_rotate %13 by %c1_i32 dim 1 : vector<8x256xf32>, i32 -> vector<8x256xf32>
    %17 = arith.mulf %16, %3 : vector<8x256xf32>
    %18 = arith.subf %15, %17 : vector<8x256xf32>
    %19 = arith.addf %13, %13 : vector<8x256xf32>
    %20 = arith.addf %17, %19 : vector<8x256xf32>
    %21 = arith.addf %20, %15 : vector<8x256xf32>
    %c16_i32 = arith.constant 16 : i32
    %22 = tpu.dynamic_rotate %18 by %c16_i32 dim 1 : vector<8x256xf32>, i32 -> vector<8x256xf32>
    %23 = arith.mulf %22, %9 : vector<8x256xf32>
    %c240_i32 = arith.constant 240 : i32
    %24 = tpu.dynamic_rotate %18 by %c240_i32 dim 1 : vector<8x256xf32>, i32 -> vector<8x256xf32>
    %25 = arith.mulf %24, %12 : vector<8x256xf32>
    %c16_i32_3 = arith.constant 16 : i32
    %26 = tpu.dynamic_rotate %21 by %c16_i32_3 dim 1 : vector<8x256xf32>, i32 -> vector<8x256xf32>
    %27 = arith.mulf %26, %9 : vector<8x256xf32>
    %c240_i32_4 = arith.constant 240 : i32
    %28 = tpu.dynamic_rotate %21 by %c240_i32_4 dim 1 : vector<8x256xf32>, i32 -> vector<8x256xf32>
    %29 = arith.mulf %28, %12 : vector<8x256xf32>
    %30 = arith.addf %18, %18 : vector<8x256xf32>
    %31 = arith.addf %23, %30 : vector<8x256xf32>
    %32 = arith.addf %31, %25 : vector<8x256xf32>
    %33 = arith.subf %29, %27 : vector<8x256xf32>
    %34 = arith.mulf %32, %32 : vector<8x256xf32>
    %35 = arith.mulf %33, %33 : vector<8x256xf32>
    %36 = arith.addf %34, %35 : vector<8x256xf32>
    %cst = arith.constant 9.99999997E-7 : f32
    %37 = vector.broadcast %cst : f32 to vector<8x256xf32>
    %38 = arith.addf %36, %37 : vector<8x256xf32>
    %39 = math.sqrt %38 : vector<8x256xf32>
    %c0_5 = arith.constant 0 : index
    %c0_6 = arith.constant 0 : index
    %40 = vector.load %arg3[%c0_5, %c0_6] : memref<8x256xf32, #tpu.memory_space<vmem>>, vector<8x256xf32>
    tpu.vector_store %arg3[%c0_5, %c0_6], %39 {strides = array<i32>} : memref<8x256xf32, #tpu.memory_space<vmem>>, vector<8x256xf32>,
    return
  }
  func.func @transform_0(%arg0: i32) -> (i32, i32) {
    %c0_i32 = arith.constant 0 : i32
    %c0_i32_0 = arith.constant 0 : i32
    %c0_i32_1 = arith.constant 0 : i32
    return %c0_i32, %c0_i32_0 : i32, i32
  }
  func.func @transform_1(%arg0: i32) -> (i32, i32) {
    %c0_i32 = arith.constant 0 : i32
    %c0_i32_0 = arith.constant 0 : i32
    return %arg0, %c0_i32 : i32, i32
  }
  func.func @transform_2(%arg0: i32) -> (i32, i32) {
    %c0_i32 = arith.constant 0 : i32
    %c0_i32_0 = arith.constant 0 : i32
    return %arg0, %c0_i32 : i32, i32
  }
}

</mosaic_0001>

<bundles_post_ra>
// kernel: tpu_custom_call.1
= control target key start
LH: loop header
LB: loop body
LE: loop exit
PB: predicated region body
PF: predicated region fallthrough
CT: control target
= control target key end

     0   :  { %7 = vsyncpa [#allocation3], 0  ;;  %s385_s0 = inlined_call_operand.hbm [shape: f32[4,256], index: 0, kind: input, shape index: {}]   ;;  %s386_s1 = inlined_call_operand.hbm [shape: f32[8,256], index: 1, kind: input, shape index: {}]   ;;  %s387_s2 = inlined_call_operand.hbm [shape: f32[8,256], index: 2, kind: output, shape index: {}]  }
   0x1   :  { %8 = vsyncpa [#allocation6], 0 }
   0x2   :  { %9 = vsyncpa [#allocation4], 0  ;;  %s305_s9 = smov [#allocation2]   ;;  %s306_s11 = smov [#allocation5]  }
   0x3   :  { %s16_s10 = sshll.u32 %s305_s9, 4  ;;  %s26_s12 = sshll.u32 %s306_s11, 4  ;;  %s17_s10 = int_to_ptr.vmem [resolvable:$true] %s16_s10  ;;  %s27_s12 = int_to_ptr.vmem [resolvable:$true] %s26_s12 }
   0x4   :  { %s233_s15 = scalar_lea.hbm %s385_s0, 128 }
   0x5   :  { %p234_p0 = scmp.ne.s32.totalorder %s385_s0, %s233_s15  ;;  %p237_p1 = scmp.lt.u32.totalorder %s233_s15, %s385_s0 }
   0x7   :  { %p239_p2 = pnand %p237_p1, %p234_p0 }
   0x9   :  { %242 = shalt.err (!%p239_p2)
}
   0xa   :  { %s243_s20 = scalar_lea.vmem %s17_s10, 128  ;;  %p248_p4 = scmp.lt.s32.totalorder %s17_s10, %s17_s10 }
   0xb   :  { %p244_p3 = scmp.ne.s32.totalorder %s17_s10, %s243_s20  ;;  %p249_p5 = scmp.lt.s32.totalorder %s243_s20, %s243_s20 }
   0xd   :  { %p250_p6 = por %p249_p5, %p248_p4 }
   0xf   :  { %p251_p7 = pnand %p250_p6, %p244_p3 }
  0x11   :  { %254 = shalt.err (!%p251_p7)
}
  0x12   :  { %19 = dma.hbm_to_vmem [thread:$0]  %s385_s0, 128, %s17_s10, [#allocation3]  }
  0x13   :  { %s255_s25 = scalar_lea.hbm %s386_s1, 256 }
  0x14   :  { %p256_p8 = scmp.ne.s32.totalorder %s386_s1, %s255_s25  ;;  %p259_p9 = scmp.lt.u32.totalorder %s255_s25, %s386_s1 }
  0x16   :  { %p261_p10 = pnand %p259_p9, %p256_p8 }
  0x18   :  { %264 = shalt.err (!%p261_p10)
}
  0x19   :  { %s265_s30 = scalar_lea.vmem %s27_s12, 256  ;;  %p270_p12 = scmp.lt.s32.totalorder %s27_s12, %s27_s12 }
  0x1a   :  { %p266_p11 = scmp.ne.s32.totalorder %s27_s12, %s265_s30  ;;  %p271_p13 = scmp.lt.s32.totalorder %s265_s30, %s265_s30 }
  0x1c   :  { %p272_p0 = por %p271_p13, %p270_p12 }
  0x1e   :  { %p273_p1 = pnand %p272_p0, %p266_p11 }
  0x20   :  { %276 = shalt.err (!%p273_p1)
}
  0x21   :  { %29 = dma.hbm_to_vmem [thread:$0]  %s386_s1, 256, %s27_s12, [#allocation6]  }
  0x22   :  { %299 = dma.done.wait [#allocation3], 128  }
  0x23   :  { %300 = vsyncadd [#allocation3], 4294967168 }
  0x24   :  { %301 = dma.done.wait [#allocation6], 256  }
  0x25   :  { %302 = vsyncadd [#allocation6], 4294967040  ;;  %v110_v0 = vld [vmem:[#allocation5] sm:$0xff]  ;;  %s307_s4 = smov 1   ;;  %s308_s5 = smov 127   ;;  %v111_v1 = vld [vmem:[#allocation5 + $0x8] sm:$0xff]  ;;  %v38_v2 = vlaneseq }
  0x26   :  { %123 = vrot.lane.b32.xlu1 %v110_v0, %s307_s4  ;;  %112 = vrot.lane.b32.xlu0 %v110_v0, %s308_s5  ;;  %v36_v8 = vld [vmem:[#allocation2] sm:$0xff]  ;;  %v134_v30 = vadd.f32 %v110_v0, %v110_v0  ;;  %v135_v31 = vadd.f32 %v111_v1, %v111_v1  ;;  %s309_s1 = smov 16   ;;  %s310_s6 = smov 112  }
  0x27   :  { %v39_v3 = vshrl.u32 %v38_v2, 7  ;;  %v351_v9 = vand.u32 127, %v38_v2  ;;  %s311_s7 = smov [#allocation7]  }
  0x28   :  { %s212_s8 = sshll.u32 %s311_s7, 4  ;;  %s213_s8 = int_to_ptr.vmem [resolvable:$true] %s212_s8 }
  0x29   :  { %v40_v4 = vsub.s32 0, %v39_v3  ;;  %v44_v5 = vsub.s32 4, %v39_v3  ;;  %v58_v6 = vsub.s32 1, %v39_v3  ;;  %v62_v7 = vsub.s32 5, %v39_v3  ;;  %s277_s9 = scalar_lea.vmem %s213_s8, 256  ;;  %p282_p3 = scmp.lt.s32.totalorder %s213_s8, %s213_s8 }
  0x2a   :  { %125 = vrot.lane.b32.xlu1 %v111_v1, %s307_s4  ;;  %114 = vrot.lane.b32.xlu0 %v111_v1, %s308_s5  ;;  %vm127_vm0 = vcmp.lt.s32.totalorder %v351_v9, 1  ;;  %vm118_vm1 = vcmp.lt.s32.totalorder %v351_v9, 127  ;;  %v76_v38 = vsub.s32 2, %v39_v3  ;;  %v80_v39 = vsub.s32 6, %v39_v3  ;;  %p278_p2 = scmp.ne.s32.totalorder %s213_s8, %s277_s9  ;;  %p283_p4 = scmp.lt.s32.totalorder %s277_s9, %s277_s9 }
  0x2b   :  { %v41_v10 = vrot.slane %v36_v8, %v40_v4  ;;  %v45_v11 = vrot.slane %v36_v8, %v44_v5  ;;  %v59_v12 = vrot.slane %v36_v8, %v58_v6  ;;  %v63_v13 = vrot.slane %v36_v8, %v62_v7 }
  0x2c   :  { %v94_v40 = vsub.s32 3, %v39_v3  ;;  %v98_v41 = vsub.s32 7, %v39_v3  ;;  %v77_v42 = vrot.slane %v36_v8, %v76_v38  ;;  %v81_v43 = vrot.slane %v36_v8, %v80_v39  ;;  %p284_p5 = por %p283_p4, %p282_p3 }
  0x2d   :  { %v51_v16 = vrot.slane %v41_v10, %v40_v4  ;;  %v55_v17 = vrot.slane %v45_v11, %v40_v4  ;;  %v69_v18 = vrot.slane %v59_v12, %v58_v6  ;;  %v73_v19 = vrot.slane %v63_v13, %v58_v6 }
  0x2e   :  { %vm144_vm2 = vcmp.lt.s32.totalorder %v351_v9, 16  ;;  %v95_v46 = vrot.slane %v36_v8, %v94_v40  ;;  %v99_v47 = vrot.slane %v36_v8, %v98_v41  ;;  %v87_v48 = vrot.slane %v77_v42, %v76_v38  ;;  %p285_p6 = pnand %p284_p5, %p278_p2 }
  0x2f   :  { %v91_v49 = vrot.slane %v81_v43, %v76_v38  ;;  %vm153_vm3 = vcmp.lt.s32.totalorder %v351_v9, 112 }
  0x30   :  { %v105_v54 = vrot.slane %v95_v46, %v94_v40  ;;  %v109_v55 = vrot.slane %v99_v47, %v94_v40 }
  0x98   :  { %v124_v14 = vpop.permute.xlu1 %123  ;;  %v113_v15 = vpop.permute.xlu0 %112 }
  0x9c   :  { %v126_v20 = vpop.permute.xlu1 %125  ;;  %v115_v21 = vpop.permute.xlu0 %114 }
  0x9d   :  { %v128_v22 = vsel %vm127_vm0, %v124_v14, %v126_v20  ;;  %v129_v23 = vsel %vm127_vm0, %v126_v20, %v124_v14  ;;  %v119_v24 = vsel %vm118_vm1, %v113_v15, %v115_v21  ;;  %v120_v25 = vsel %vm118_vm1, %v115_v21, %v113_v15 }
  0x9e   :  { %v130_v26 = vmul.f32 %v129_v23, %v51_v16  ;;  %v131_v27 = vmul.f32 %v128_v22, %v55_v17  ;;  %v121_v28 = vmul.f32 %v119_v24, %v69_v18  ;;  %v122_v29 = vmul.f32 %v120_v25, %v73_v19 }
  0xa0   :  { %v133_v32 = vsub.f32 %v122_v29, %v131_v27  ;;  %v132_v33 = vsub.f32 %v121_v28, %v130_v26  ;;  %v136_v34 = vadd.f32 %v134_v30, %v130_v26  ;;  %v137_v35 = vadd.f32 %v135_v31, %v131_v27 }
  0xa2   :  { %142 = vrot.lane.b32.xlu1 %v133_v32, %s309_s1  ;;  %140 = vrot.lane.b32.xlu0 %v132_v33, %s309_s1  ;;  %v139_v36 = vadd.f32 %v137_v35, %v122_v29  ;;  %v138_v37 = vadd.f32 %v136_v34, %v121_v28  ;;  %v175_v62 = vadd.f32 %v133_v32, %v133_v32 }
  0xa3   :  { %v174_v63 = vadd.f32 %v132_v33, %v132_v33 }
  0xa6   :  { %151 = vrot.lane.b32.xlu1 %v133_v32, %s310_s6  ;;  %149 = vrot.lane.b32.xlu0 %v132_v33, %s310_s6 }
  0xaa   :  { %160 = vrot.lane.b32.xlu1 %v139_v36, %s309_s1  ;;  %158 = vrot.lane.b32.xlu0 %v138_v37, %s309_s1 }
  0xae   :  { %168 = vrot.lane.b32.xlu1 %v139_v36, %s310_s6  ;;  %166 = vrot.lane.b32.xlu0 %v138_v37, %s310_s6 }
 0x114   :  { %v143_v44 = vpop.permute.xlu1 %142  ;;  %v141_v45 = vpop.permute.xlu0 %140 }
 0x115   :  { %v145_v50 = vsel %vm144_vm2, %v141_v45, %v143_v44  ;;  %v146_v51 = vsel %vm144_vm2, %v143_v44, %v141_v45 }
 0x116   :  { %v147_v58 = vmul.f32 %v146_v51, %v87_v48  ;;  %v148_v59 = vmul.f32 %v145_v50, %v91_v49 }
 0x118   :  { %v152_v52 = vpop.permute.xlu1 %151  ;;  %v150_v53 = vpop.permute.xlu0 %149  ;;  %v176_v2 = vadd.f32 %v174_v63, %v147_v58  ;;  %v177_v3 = vadd.f32 %v175_v62, %v148_v59 }
 0x119   :  { %v154_v56 = vsel %vm153_vm3, %v150_v53, %v152_v52  ;;  %v155_v57 = vsel %vm153_vm3, %v152_v52, %v150_v53 }
 0x11a   :  { %v156_v0 = vmul.f32 %v154_v56, %v105_v54  ;;  %v157_v1 = vmul.f32 %v155_v57, %v109_v55 }
 0x11c   :  { %v161_v60 = vpop.permute.xlu1 %160  ;;  %v159_v61 = vpop.permute.xlu0 %158  ;;  %v178_v8 = vadd.f32 %v176_v2, %v156_v0  ;;  %v179_v10 = vadd.f32 %v177_v3, %v157_v1 }
 0x11d   :  { %v162_v4 = vsel %vm144_vm2, %v159_v61, %v161_v60  ;;  %v163_v5 = vsel %vm144_vm2, %v161_v60, %v159_v61 }
 0x11e   :  { %v164_v13 = vmul.f32 %v163_v5, %v87_v48  ;;  %v165_v14 = vmul.f32 %v162_v4, %v91_v49  ;;  %v182_v19 = vmul.f32 %v178_v8, %v178_v8  ;;  %v183_v20 = vmul.f32 %v179_v10, %v179_v10 }
 0x120   :  { %v169_v6 = vpop.permute.xlu1 %168  ;;  %v167_v7 = vpop.permute.xlu0 %166 }
 0x121   :  { %v170_v11 = vsel %vm153_vm3, %v167_v7, %v169_v6  ;;  %v171_v12 = vsel %vm153_vm3, %v169_v6, %v167_v7 }
 0x122   :  { %v172_v15 = vmul.f32 %v170_v11, %v105_v54  ;;  %v173_v16 = vmul.f32 %v171_v12, %v109_v55 }
 0x124   :  { %v180_v17 = vsub.f32 %v172_v15, %v164_v13  ;;  %v181_v18 = vsub.f32 %v173_v16, %v165_v14 }
 0x126   :  { %v184_v21 = vmul.f32 %v180_v17, %v180_v17  ;;  %v185_v22 = vmul.f32 %v181_v18, %v181_v18 }
 0x128   :  { %v186_v23 = vadd.f32 %v184_v21, %v182_v19  ;;  %v187_v24 = vadd.f32 %v185_v22, %v183_v20 }
 0x12a   :  { %v188_v25 = vadd.f32 1e-06, %v186_v23  ;;  %v189_v26 = vadd.f32 1e-06, %v187_v24 }
 0x12c   :  { %229 = vrsqrt.f32 %v188_v25  ;;  %vm192_vm4 = vcmp.eq.f32.partialorder %v188_v25, inf  ;;  %v195_v29 = vand.u32 2147483648, %v188_v25  ;;  %vm194_vm5 = vcmp.eq.f32.partialorder %v188_v25, 0.0 }
 0x12d   :  { %231 = vrsqrt.f32 %v189_v26  ;;  %vm199_vm6 = vcmp.eq.f32.partialorder %v189_v26, inf  ;;  %v202_v32 = vand.u32 2147483648, %v189_v26  ;;  %vm201_vm7 = vcmp.eq.f32.partialorder %v189_v26, 0.0 }
 0x136   :  { %v230_v27 = vpop.eup %229 }
 0x137   :  { %v232_v28 = vpop.eup %231  ;;  %v191_v9 = vmul.f32 %v230_v27, %v188_v25 }
 0x138   :  { %v198_v30 = vmul.f32 %v232_v28, %v189_v26 }
 0x139   :  { %v193_v31 = vsel %vm192_vm4, %v188_v25, %v191_v9 }
 0x13a   :  { %v196_v33 = vsel %vm194_vm5, %v195_v29, %v193_v31  ;;  %v200_v34 = vsel %vm199_vm6, %v189_v26, %v198_v30 }
 0x13b   :  { %v203_v35 = vsel %vm201_vm7, %v202_v32, %v200_v34  ;;  %204 = vst [vmem:[#allocation7] sm:$0xff] %v196_v33 }
 0x13c   :  { %205 = vst [vmem:[#allocation7 + $0x8] sm:$0xff] %v203_v35 }
 0x13d   :  { %288 = shalt.err (!%p285_p6)
}
 0x13e   :  { %s289_s12 = scalar_lea.hbm %s387_s2, 256 }
 0x13f   :  { %p290_p7 = scmp.ne.s32.totalorder %s387_s2, %s289_s12  ;;  %p293_p8 = scmp.lt.u32.totalorder %s289_s12, %s387_s2 }
 0x141   :  { %p295_p9 = pnand %p293_p8, %p290_p7 }
 0x143   :  { %298 = shalt.err (!%p295_p9)
}
 0x144   :  { %215 = dma.vmem_to_hbm [thread:$0]  %s213_s8, 256, %s387_s2, [#allocation4]  }
 0x145   :  { %303 = dma.done.wait [#allocation4], 256  }
 0x146   :  { %304 = vsyncadd [#allocation4], 4294967040 }
 0x147   :  { %219 = vsyncpa [#allocation3], 1 }
 0x148   :  { %220 = vsyncpa [#allocation6], 1 }
 0x149   :  { %221 = vsyncpa [#allocation4], 1 }

</bundles_post_ra>
